<compile_context>
chip_gen: v7x
topology: tpu7x:2x2x1
jax: 0.10.0
libtpu: 0.0.40
codegen_flags: <defaults>
</compile_context>

<pallas_src>
import jax
import jax.numpy as jnp
from jax import lax
from jax.experimental import pallas as pl
from jax.experimental.pallas import tpu as pltpu

LEAKY_SLOPE = 0.01
BN_EPS = 1e-5
NEG_INF = -1e30


def _gnn_kernel(x_ref, a_cat_ref, a_bias_ref, rowv_ref,
                w_rel_ref, w_root_ref, b1_ref,
                wqkvs_ref, bqkvs_ref, bn_ref,
                out_ref):
    f32 = jnp.float32
    bf16 = jnp.bfloat16

    x = x_ref[...]                                   # (N, G) bf16
    n = x.shape[0]
    rp = w_rel_ref.shape[0]                          # padded #relations (mult of 8)
    h1 = w_rel_ref.shape[2]
    h2 = bn_ref.shape[1]

    # ---- RGCNConv: h_i = x_i W_root + sum_r mean_{j in N_r(i)} x_j W_r + b1
    # Per-relation projection: batched MXU contraction over r (both operands
    # carry the r axis; proven lowering path).
    xb = jnp.broadcast_to(x, (rp,) + x.shape)        # (Rp, N, G) bf16
    xs = jnp.einsum('rng,rgh->rnh', xb, w_rel_ref[...],
                    preferred_element_type=f32)      # (Rp, N, h1) f32
    # Pure-layout collapse (N % 8 == 0, Rp % 8 == 0): rows ordered r*N + j.
    xs_flat = xs.reshape(rp * n, h1).astype(bf16)    # (Rp*N, h1) bf16
    # ONE aggregation matmul, K = Rp*N = full-lane contraction.
    h = (jnp.dot(a_cat_ref[...], xs_flat, preferred_element_type=f32)
         + jnp.dot(x, w_root_ref[...], preferred_element_type=f32)
         + b1_ref[...])                              # (N, h1) f32

    # ---- TransformerConv (heads=1, concat=True): fused q|k|v|skip projection.
    proj = jnp.dot(h.astype(bf16), wqkvs_ref[...],
                   preferred_element_type=f32) + bqkvs_ref[...]   # (N, 4*h2)
    q = proj[:, 0 * h2:1 * h2]
    k = proj[:, 1 * h2:2 * h2]
    v = proj[:, 2 * h2:3 * h2]
    skip = proj[:, 3 * h2:4 * h2]                    # already includes b_skip

    scale = 1.0 / jnp.sqrt(jnp.float32(h2))
    # scores[i, j] = q_i . k_j  — contract last dims, no explicit transpose.
    scores = lax.dot_general(q.astype(bf16), k.astype(bf16),
                             (((1,), (1,)), ((), ())),
                             preferred_element_type=f32) * scale
    masked = scores + a_bias_ref[...]                # additive mask (0 / -1e30) f32
    m = jnp.max(masked, axis=-1, keepdims=True)
    e = jnp.exp(masked - m)                          # masked entries underflow to 0
    denom = jnp.sum(e, axis=-1, keepdims=True)
    alpha = e * pl.reciprocal(denom, approx=True)
    agg = jnp.dot(alpha.astype(bf16), v.astype(bf16),
                  preferred_element_type=f32)        # (N, h2)
    # zero attention output for nodes with no incoming edge (matches PyG).
    out2 = agg * rowv_ref[...] + skip

    # ---- BatchNorm1d over the node (batch) axis — single-pass statistics.
    # (fine at this scale; prefer two-pass/Welford if activations grow.)
    inv_n = 1.0 / jnp.float32(n)
    s1 = jnp.sum(out2, axis=0, keepdims=True)
    s2 = jnp.sum(out2 * out2, axis=0, keepdims=True)
    mean = s1 * inv_n
    var = jnp.maximum(s2 * inv_n - mean * mean, 0.0)
    gamma = bn_ref[0:1, :]
    beta = bn_ref[1:2, :]
    y = (out2 - mean) * lax.rsqrt(var + BN_EPS) * gamma + beta

    # ---- leaky_relu (negative_slope = 0.01)
    out_ref[...] = jnp.where(y > 0, y, LEAKY_SLOPE * y)


def densify_graph(edge_index, edge_type, num_nodes, num_relations, rp):
    """Plain-JAX glue for one graph.

    Builds the flattened (N, Rp*N) mean-aggregation operator (column block r
    holds relation r's row-normalized adjacency; relations padded with zeros to
    Rp, a multiple of 8), the additive attention bias, and the row-valid mask.
    """
    src = edge_index[0]
    dst = edge_index[1]
    A = jnp.zeros((num_relations, num_nodes, num_nodes), dtype=jnp.float32)
    A = A.at[edge_type, dst, src].add(1.0)
    deg = A.sum(axis=-1, keepdims=True)                        # per-relation in-degree
    a_rel = A / jnp.maximum(deg, 1.0)                          # mean aggregation
    a_pad = jnp.pad(a_rel, ((0, rp - num_relations), (0, 0), (0, 0)))
    # a_cat[i, r*N + j] = a_pad[r, i, j]  — matches kernel-side xs_flat rows.
    a_cat = jnp.transpose(a_pad, (1, 0, 2)).reshape(num_nodes, rp * num_nodes)
    any_edge = A.sum(axis=0) > 0                               # (N, N): edge j->i ?
    a_bias = jnp.where(any_edge, 0.0, NEG_INF).astype(jnp.float32)
    row_valid = any_edge.any(axis=-1, keepdims=True).astype(jnp.float32)  # (N, 1)
    return a_cat, a_bias, row_valid


def gnn_forward_batched(node_features, edge_index, edge_type, params, num_relations):
    """Batch of independent graphs: grid=(B,) with a megacore-parallel axis.

    node_features: (B, N, G)   edge_index: (B, 2, E)   edge_type: (B, E)
    Each grid step runs the full module forward on one graph (BatchNorm uses
    that graph's node statistics, i.e. identical to calling the module per graph).
    """
    B, N, G = node_features.shape
    h1 = params["w_root"].shape[1]
    h2 = params["gamma"].shape[-1]
    R = num_relations
    rp = ((R + 7) // 8) * 8                                    # pad to multiple of 8

    a_cat, a_bias, row_valid = jax.vmap(
        lambda ei, et: densify_graph(ei, et, N, R, rp))(edge_index, edge_type)

    bf16 = jnp.bfloat16
    f32 = jnp.float32
    # MXU-feeding tensors in bf16 (f32 accumulation inside the kernel).
    x_bf = node_features.astype(bf16)                          # (B, N, G)
    a_cat_bf = a_cat.astype(bf16)                              # (B, N, rp*N)
    w_rel_bf = jnp.pad(params["w_rel"],
                       ((0, rp - R), (0, 0), (0, 0))).astype(bf16)  # (rp, G, h1)
    w_root_bf = params["w_root"].astype(bf16)                  # (G, h1)
    # Fused q|k|v|skip weights (h1, 4*h2) and packed biases / BN affine.
    wqkvs_bf = jnp.concatenate(
        [params["wq"], params["wk"], params["wv"], params["wskip"]], axis=1).astype(bf16)
    bqkvs = jnp.concatenate(
        [params["bq"], params["bk"], params["bv"], params["bskip"]], axis=1).astype(f32)
    bn_affine = jnp.concatenate([params["gamma"], params["beta"]], axis=0).astype(f32)
    b1 = params["b1"].astype(f32)

    def per_graph(shape):   # squeeze the graph axis; index by grid position b
        return pl.BlockSpec((None,) + shape, lambda b: (b,) + (0,) * len(shape))

    def shared(shape):      # weights: same full block every step
        return pl.BlockSpec(shape, lambda b: (0,) * len(shape))

    in_specs = [
        per_graph((N, G)),            # x
        per_graph((N, rp * N)),       # a_cat
        per_graph((N, N)),            # a_bias
        per_graph((N, 1)),            # row_valid
        shared((rp, G, h1)),          # w_rel (padded)
        shared((G, h1)),              # w_root
        shared((1, h1)),              # b1
        shared((h1, 4 * h2)),         # wqkvs
        shared((1, 4 * h2)),          # bqkvs
        shared((2, h2)),              # bn gamma/beta
    ]
    out_specs = per_graph((N, h2))

    return pl.pallas_call(
        _gnn_kernel,
        out_shape=jax.ShapeDtypeStruct((B, N, h2), jnp.float32),
        grid=(B,),
        in_specs=in_specs,
        out_specs=out_specs,
        compiler_params=pltpu.CompilerParams(
            dimension_semantics=("parallel",)),
    )(x_bf, a_cat_bf, a_bias, row_valid,
      w_rel_bf, w_root_bf, b1, wqkvs_bf, bqkvs, bn_affine)


def gnn_forward(node_features, edge_index, edge_type, params, num_relations):
    """Single-graph convenience wrapper (matches the PyTorch module signature)."""
    out = gnn_forward_batched(node_features[None], edge_index[None],
                              edge_type[None], params, num_relations)
    return out[0]


def gnn_reference(node_features, edge_index, edge_type, params, num_relations):
    """Pure-JAX f32 reference with identical math, for a correctness check."""
    x = node_features.astype(jnp.float32)
    n = x.shape[0]
    src, dst = edge_index[0], edge_index[1]
    A = jnp.zeros((num_relations, n, n), jnp.float32).at[edge_type, dst, src].add(1.0)
    a_rel = A / jnp.maximum(A.sum(-1, keepdims=True), 1.0)
    a_mask = (A.sum(0) > 0).astype(jnp.float32)
    h = x @ params["w_root"] + params["b1"]
    for r in range(num_relations):
        h = h + a_rel[r] @ (x @ params["w_rel"][r])
    q = h @ params["wq"] + params["bq"]
    k = h @ params["wk"] + params["bk"]
    v = h @ params["wv"] + params["bv"]
    scores = (q @ k.T) / jnp.sqrt(jnp.float32(q.shape[-1]))
    masked = jnp.where(a_mask > 0, scores, NEG_INF)
    e = jnp.exp(masked - masked.max(-1, keepdims=True)) * a_mask
    denom = e.sum(-1, keepdims=True)
    alpha = e / jnp.where(denom > 0, denom, 1.0)
    out2 = alpha @ v + h @ params["wskip"] + params["bskip"]
    mean = out2.mean(0, keepdims=True)
    var = ((out2 - mean) ** 2).mean(0, keepdims=True)
    y = (out2 - mean) / jnp.sqrt(var + BN_EPS) * params["gamma"] + params["beta"]
    return jnp.where(y > 0, y, LEAKY_SLOPE * y)


def init_params(key, g_dim, h1_dim, h2_dim, num_relations, heads=1):
    ks = jax.random.split(key, 12)
    s = 0.1
    hh = h2_dim * heads
    return {
        # RGCNConv
        "w_rel":  s * jax.random.normal(ks[0], (num_relations, g_dim, h1_dim), jnp.float32),
        "w_root": s * jax.random.normal(ks[1], (g_dim, h1_dim), jnp.float32),
        "b1":     s * jax.random.normal(ks[2], (1, h1_dim), jnp.float32),
        # TransformerConv (heads=1, concat=True)
        "wq":     s * jax.random.normal(ks[3], (h1_dim, hh), jnp.float32),
        "bq":     s * jax.random.normal(ks[4], (1, hh), jnp.float32),
        "wk":     s * jax.random.normal(ks[5], (h1_dim, hh), jnp.float32),
        "bk":     s * jax.random.normal(ks[6], (1, hh), jnp.float32),
        "wv":     s * jax.random.normal(ks[7], (h1_dim, hh), jnp.float32),
        "bv":     s * jax.random.normal(ks[8], (1, hh), jnp.float32),
        "wskip":  s * jax.random.normal(ks[9], (h1_dim, hh), jnp.float32),
        "bskip":  s * jax.random.normal(ks[10], (1, hh), jnp.float32),
        # BatchNorm1d (PyTorch init: weight=1, bias=0)
        "gamma":  jnp.ones((1, hh), jnp.float32),
        "beta":   jnp.zeros((1, hh), jnp.float32),
    }


if __name__ == "__main__":
    # Small config consistent with GNN(g_dim, h1_dim, h2_dim, n_speakers=2, gnn_nheads=1)
    g_dim, h1_dim, h2_dim = 16, 32, 32
    n_speakers, heads = 2, 1
    num_relations = 2 * n_speakers ** 2              # = 8
    n_nodes = 16
    n_graphs = 2                                     # batched graphs -> parallel grid

    key = jax.random.PRNGKey(0)
    k_x, k_et, k_p = jax.random.split(key, 3)

    node_features = jax.random.normal(k_x, (n_graphs, n_nodes, g_dim), jnp.float32)

    # Fixed ring-style edge structure: each node receives 3 unique incoming edges.
    srcs, dsts = [], []
    for i in range(n_nodes):
        for off in (1, 3, 7):
            srcs.append((i + off) % n_nodes)
            dsts.append(i)
    edge_single = jnp.array([srcs, dsts], dtype=jnp.int32)              # (2, E)
    edge_index = jnp.broadcast_to(edge_single,
                                  (n_graphs,) + edge_single.shape)      # (B, 2, E)
    edge_type = jax.random.randint(k_et, (n_graphs, edge_single.shape[1]),
                                   0, num_relations, dtype=jnp.int32)   # (B, E)

    params = init_params(k_p, g_dim, h1_dim, h2_dim, num_relations, heads)

    out = gnn_forward_batched(node_features, edge_index, edge_type, params,
                              num_relations)
    out = jax.block_until_ready(out)

    assert out.shape == (n_graphs, n_nodes, h2_dim * heads)
    assert jnp.all(jnp.isfinite(out))
    for b in range(n_graphs):
        ref = gnn_reference(node_features[b], edge_index[b], edge_type[b],
                            params, num_relations)
        # bf16 MXU inputs (f32 accumulation) + approx reciprocal => loose tolerance.
        assert jnp.allclose(out[b], ref, atol=5e-2, rtol=5e-2)

    print("KERNEL_OK")
</pallas_src>

<mosaic_0001>
module attributes {stable_mosaic.version = 11 : i64} {
  func.func @_gnn_kernel(%arg0: i32, %arg1: memref<1x16x16xbf16, #tpu.memory_space<vmem>>, %arg2: memref<1x16x128xbf16, #tpu.memory_space<vmem>>, %arg3: memref<1x16x16xf32, #tpu.memory_space<vmem>>, %arg4: memref<1x16x1xf32, #tpu.memory_space<vmem>>, %arg5: memref<8x16x32xbf16, #tpu.memory_space<vmem>>, %arg6: memref<16x32xbf16, #tpu.memory_space<vmem>>, %arg7: memref<1x32xf32, #tpu.memory_space<vmem>>, %arg8: memref<32x128xbf16, #tpu.memory_space<vmem>>, %arg9: memref<1x128xf32, #tpu.memory_space<vmem>>, %arg10: memref<2x32xf32, #tpu.memory_space<vmem>>, %arg11: memref<1x16x32xf32, #tpu.memory_space<vmem>>) attributes {dimension_semantics = [#tpu.dimension_semantics<parallel>], iteration_bounds = array<i64: 2>, scalar_prefetch = 0 : i64, scratch_operands = 0 : i64, tpu.core_type = #tpu.core_type<tc>, window_params = [{transform_indices = @transform_0, window_bounds = array<i64: 1, 16, 16>}, {transform_indices = @transform_1, window_bounds = array<i64: 1, 16, 128>}, {transform_indices = @transform_2, window_bounds = array<i64: 1, 16, 16>}, {transform_indices = @transform_3, window_bounds = array<i64: 1, 16, 1>}, {pipeline_mode = #tpu.pipeline_mode<synchronous>, transform_indices = @transform_4, window_bounds = array<i64: 8, 16, 32>}, {pipeline_mode = #tpu.pipeline_mode<synchronous>, transform_indices = @transform_5, window_bounds = array<i64: 16, 32>}, {pipeline_mode = #tpu.pipeline_mode<synchronous>, transform_indices = @transform_6, window_bounds = array<i64: 1, 32>}, {pipeline_mode = #tpu.pipeline_mode<synchronous>, transform_indices = @transform_7, window_bounds = array<i64: 32, 128>}, {pipeline_mode = #tpu.pipeline_mode<synchronous>, transform_indices = @transform_8, window_bounds = array<i64: 1, 128>}, {pipeline_mode = #tpu.pipeline_mode<synchronous>, transform_indices = @transform_9, window_bounds = array<i64: 2, 32>}, {transform_indices = @transform_10, window_bounds = array<i64: 1, 16, 32>}]} {
    %c0 = arith.constant 0 : index
    %c0_0 = arith.constant 0 : index
    %c0_1 = arith.constant 0 : index
    %0 = vector.load %arg1[%c0, %c0_0, %c0_1] : memref<1x16x16xbf16, #tpu.memory_space<vmem>>, vector<1x16x16xbf16>
    %1 = vector.shape_cast %0 : vector<1x16x16xbf16> to vector<16x16xbf16>
    %2 = vector.shape_cast %1 : vector<16x16xbf16> to vector<1x16x16xbf16>
    %3 = vector.broadcast %2 : vector<1x16x16xbf16> to vector<8x16x16xbf16>
    %c0_2 = arith.constant 0 : index
    %c0_3 = arith.constant 0 : index
    %c0_4 = arith.constant 0 : index
    %4 = vector.load %arg5[%c0_2, %c0_3, %c0_4] : memref<8x16x32xbf16, #tpu.memory_space<vmem>>, vector<8x16x32xbf16>
    "tpu.trace_start"() <{level = 10 : i32, message = "rng,rgh->rnh"}> : () -> ()
    %cst = arith.constant dense<0.000000e+00> : vector<8x16x32xf32>
    %5 = tpu.matmul %3, %4, %cst {dimension_numbers = #tpu.dot_dimension_numbers<[2], [1], [1], [2], [0, 0, 0, 1, 1, 2], [0], [0]>} : vector<8x16x16xbf16>, vector<8x16x32xbf16>, vector<8x16x32xf32> -> vector<8x16x32xf32>
    "tpu.trace_stop"() : () -> ()
    %6 = vector.shape_cast %5 : vector<8x16x32xf32> to vector<128x32xf32>
    %7 = arith.truncf %6 : vector<128x32xf32> to vector<128x32xbf16>
    %c0_5 = arith.constant 0 : index
    %c0_6 = arith.constant 0 : index
    %c0_7 = arith.constant 0 : index
    %8 = vector.load %arg2[%c0_5, %c0_6, %c0_7] : memref<1x16x128xbf16, #tpu.memory_space<vmem>>, vector<1x16x128xbf16>
    %9 = vector.shape_cast %8 : vector<1x16x128xbf16> to vector<16x128xbf16>
    %cst_8 = arith.constant dense<0.000000e+00> : vector<16x32xf32>
    %10 = tpu.matmul %9, %7, %cst_8 {dimension_numbers = #tpu.dot_dimension_numbers<[1], [0], [0], [1], [0, 0, 1, 1], [], []>} : vector<16x128xbf16>, vector<128x32xbf16>, vector<16x32xf32> -> vector<16x32xf32>
    %c0_9 = arith.constant 0 : index
    %c0_10 = arith.constant 0 : index
    %11 = vector.load %arg6[%c0_9, %c0_10] : memref<16x32xbf16, #tpu.memory_space<vmem>>, vector<16x32xbf16>
    %cst_11 = arith.constant dense<0.000000e+00> : vector<16x32xf32>
    %12 = tpu.matmul %1, %11, %cst_11 {dimension_numbers = #tpu.dot_dimension_numbers<[1], [0], [0], [1], [0, 0, 1, 1], [], []>} : vector<16x16xbf16>, vector<16x32xbf16>, vector<16x32xf32> -> vector<16x32xf32>
    %13 = arith.addf %10, %12 : vector<16x32xf32>
    %c0_12 = arith.constant 0 : index
    %c0_13 = arith.constant 0 : index
    %14 = vector.load %arg7[%c0_12, %c0_13] : memref<1x32xf32, #tpu.memory_space<vmem>>, vector<1x32xf32>
    %15 = vector.broadcast %14 : vector<1x32xf32> to vector<16x32xf32>
    %16 = arith.addf %13, %15 : vector<16x32xf32>
    %17 = arith.truncf %16 : vector<16x32xf32> to vector<16x32xbf16>
    %c0_14 = arith.constant 0 : index
    %c0_15 = arith.constant 0 : index
    %18 = vector.load %arg8[%c0_14, %c0_15] : memref<32x128xbf16, #tpu.memory_space<vmem>>, vector<32x128xbf16>
    %cst_16 = arith.constant dense<0.000000e+00> : vector<16x128xf32>
    %19 = tpu.matmul %17, %18, %cst_16 {dimension_numbers = #tpu.dot_dimension_numbers<[1], [0], [0], [1], [0, 0, 1, 1], [], []>} : vector<16x32xbf16>, vector<32x128xbf16>, vector<16x128xf32> -> vector<16x128xf32>
    %c0_17 = arith.constant 0 : index
    %c0_18 = arith.constant 0 : index
    %20 = vector.load %arg9[%c0_17, %c0_18] : memref<1x128xf32, #tpu.memory_space<vmem>>, vector<1x128xf32>
    %21 = vector.broadcast %20 : vector<1x128xf32> to vector<16x128xf32>
    %22 = arith.addf %19, %21 : vector<16x128xf32>
    %23 = vector.extract_strided_slice %22 {offsets = [0, 0], sizes = [16, 32], strides = [1, 1]} : vector<16x128xf32> to vector<16x32xf32>
    %24 = vector.extract_strided_slice %22 {offsets = [0, 32], sizes = [16, 32], strides = [1, 1]} : vector<16x128xf32> to vector<16x32xf32>
    %25 = vector.extract_strided_slice %22 {offsets = [0, 64], sizes = [16, 32], strides = [1, 1]} : vector<16x128xf32> to vector<16x32xf32>
    %26 = vector.extract_strided_slice %22 {offsets = [0, 96], sizes = [16, 32], strides = [1, 1]} : vector<16x128xf32> to vector<16x32xf32>
    %cst_19 = arith.constant 3.200000e+01 : f32
    %27 = math.sqrt %cst_19 : f32
    %cst_20 = arith.constant 1.000000e+00 : f32
    %28 = arith.divf %cst_20, %27 : f32
    %29 = arith.truncf %23 : vector<16x32xf32> to vector<16x32xbf16>
    %30 = arith.truncf %24 : vector<16x32xf32> to vector<16x32xbf16>
    %cst_21 = arith.constant dense<0.000000e+00> : vector<16x16xf32>
    %31 = tpu.matmul %29, %30, %cst_21 {dimension_numbers = #tpu.dot_dimension_numbers<[1], [1], [0], [0], [0, 0, 1, 0], [], []>} : vector<16x32xbf16>, vector<16x32xbf16>, vector<16x16xf32> -> vector<16x16xf32>
    %32 = vector.broadcast %28 : f32 to vector<16x16xf32>
    %33 = arith.mulf %31, %32 : vector<16x16xf32>
    %c0_22 = arith.constant 0 : index
    %c0_23 = arith.constant 0 : index
    %c0_24 = arith.constant 0 : index
    %34 = vector.load %arg3[%c0_22, %c0_23, %c0_24] : memref<1x16x16xf32, #tpu.memory_space<vmem>>, vector<1x16x16xf32>
    %35 = vector.shape_cast %34 : vector<1x16x16xf32> to vector<16x16xf32>
    %36 = arith.addf %33, %35 : vector<16x16xf32>
    %cst_25 = arith.constant dense<0xFF800000> : vector<16xf32>
    %37 = vector.multi_reduction <maximumf>, %36, %cst_25 [1] : vector<16x16xf32> to vector<16xf32>
    %38 = vector.shape_cast %37 : vector<16xf32> to vector<16x1xf32>
    %39 = vector.broadcast %38 : vector<16x1xf32> to vector<16x16xf32>
    %40 = arith.subf %36, %39 : vector<16x16xf32>
    %41 = math.exp %40 : vector<16x16xf32>
    %cst_26 = arith.constant dense<0.000000e+00> : vector<16xf32>
    %42 = vector.multi_reduction <add>, %41, %cst_26 [1] : vector<16x16xf32> to vector<16xf32>
    %43 = vector.shape_cast %42 : vector<16xf32> to vector<16x1xf32>
    %44 = tpu.reciprocal %43 {approx = true} : vector<16x1xf32> -> vector<16x1xf32>
    %45 = vector.broadcast %44 : vector<16x1xf32> to vector<16x16xf32>
    %46 = arith.mulf %41, %45 : vector<16x16xf32>
    %47 = arith.truncf %46 : vector<16x16xf32> to vector<16x16xbf16>
    %48 = arith.truncf %25 : vector<16x32xf32> to vector<16x32xbf16>
    %cst_27 = arith.constant dense<0.000000e+00> : vector<16x32xf32>
    %49 = tpu.matmul %47, %48, %cst_27 {dimension_numbers = #tpu.dot_dimension_numbers<[1], [0], [0], [1], [0, 0, 1, 1], [], []>} : vector<16x16xbf16>, vector<16x32xbf16>, vector<16x32xf32> -> vector<16x32xf32>
    %c0_28 = arith.constant 0 : index
    %c0_29 = arith.constant 0 : index
    %c0_30 = arith.constant 0 : index
    %50 = vector.load %arg4[%c0_28, %c0_29, %c0_30] : memref<1x16x1xf32, #tpu.memory_space<vmem>>, vector<1x16x1xf32>
    %51 = vector.shape_cast %50 : vector<1x16x1xf32> to vector<16x1xf32>
    %52 = vector.broadcast %51 : vector<16x1xf32> to vector<16x32xf32>
    %53 = arith.mulf %49, %52 : vector<16x32xf32>
    %54 = arith.addf %53, %26 : vector<16x32xf32>
    %cst_31 = arith.constant 1.000000e+00 : f32
    %cst_32 = arith.constant 1.600000e+01 : f32
    %55 = arith.divf %cst_31, %cst_32 : f32
    %cst_33 = arith.constant dense<0.000000e+00> : vector<32xf32>
    %56 = vector.multi_reduction <add>, %54, %cst_33 [0] : vector<16x32xf32> to vector<32xf32>
    %57 = vector.shape_cast %56 : vector<32xf32> to vector<1x32xf32>
    %58 = arith.mulf %54, %54 : vector<16x32xf32>
    %cst_34 = arith.constant dense<0.000000e+00> : vector<32xf32>
    %59 = vector.multi_reduction <add>, %58, %cst_34 [0] : vector<16x32xf32> to vector<32xf32>
    %60 = vector.shape_cast %59 : vector<32xf32> to vector<1x32xf32>
    %61 = vector.broadcast %55 : f32 to vector<1x32xf32>
    %62 = arith.mulf %57, %61 : vector<1x32xf32>
    %63 = vector.broadcast %55 : f32 to vector<1x32xf32>
    %64 = arith.mulf %60, %63 : vector<1x32xf32>
    %65 = arith.mulf %62, %62 : vector<1x32xf32>
    %66 = arith.subf %64, %65 : vector<1x32xf32>
    %cst_35 = arith.constant 0.000000e+00 : f32
    %67 = vector.broadcast %cst_35 : f32 to vector<1x32xf32>
    %68 = arith.maximumf %66, %67 : vector<1x32xf32>
    %c0_36 = arith.constant 0 : index
    %c0_37 = arith.constant 0 : index
    %69 = vector.load %arg10[%c0_36, %c0_37] : memref<2x32xf32, #tpu.memory_space<vmem>>, vector<1x32xf32>
    %c1 = arith.constant 1 : index
    %c0_38 = arith.constant 0 : index
    %70 = vector.load %arg10[%c1, %c0_38] : memref<2x32xf32, #tpu.memory_space<vmem>>, vector<1x32xf32>
    %71 = vector.broadcast %62 : vector<1x32xf32> to vector<16x32xf32>
    %72 = arith.subf %54, %71 : vector<16x32xf32>
    %cst_39 = arith.constant 9.99999974E-6 : f32
    %73 = vector.broadcast %cst_39 : f32 to vector<1x32xf32>
    %74 = arith.addf %68, %73 : vector<1x32xf32>
    %75 = math.rsqrt %74 : vector<1x32xf32>
    %76 = vector.broadcast %75 : vector<1x32xf32> to vector<16x32xf32>
    %77 = arith.mulf %72, %76 : vector<16x32xf32>
    %78 = vector.broadcast %69 : vector<1x32xf32> to vector<16x32xf32>
    %79 = arith.mulf %77, %78 : vector<16x32xf32>
    %80 = vector.broadcast %70 : vector<1x32xf32> to vector<16x32xf32>
    %81 = arith.addf %79, %80 : vector<16x32xf32>
    %cst_40 = arith.constant 0.000000e+00 : f32
    %82 = vector.broadcast %cst_40 : f32 to vector<16x32xf32>
    %83 = arith.cmpf ogt, %81, %82 : vector<16x32xf32>
    %cst_41 = arith.constant 0.00999999977 : f32
    %84 = vector.broadcast %cst_41 : f32 to vector<16x32xf32>
    %85 = arith.mulf %84, %81 : vector<16x32xf32>
    %86 = arith.select %83, %81, %85 : vector<16x32xi1>, vector<16x32xf32>
    %c0_42 = arith.constant 0 : index
    %c0_43 = arith.constant 0 : index
    %c0_44 = arith.constant 0 : index
    %87 = vector.load %arg11[%c0_42, %c0_43, %c0_44] : memref<1x16x32xf32, #tpu.memory_space<vmem>>, vector<1x16x32xf32>
    %88 = vector.shape_cast %87 : vector<1x16x32xf32> to vector<16x32xf32>
    %89 = vector.shape_cast %86 : vector<16x32xf32> to vector<1x16x32xf32>
    tpu.vector_store %arg11[%c0_42, %c0_43, %c0_44], %89 {strides = array<i32>} : memref<1x16x32xf32, #tpu.memory_space<vmem>>, vector<1x16x32xf32>,
    return
  }
  func.func @transform_0(%arg0: i32) -> (i32, i32, i32) {
    %c0_i32 = arith.constant 0 : i32
    %c0_i32_0 = arith.constant 0 : i32
    %c0_i32_1 = arith.constant 0 : i32
    return %arg0, %c0_i32, %c0_i32_0 : i32, i32, i32
  }
  func.func @transform_1(%arg0: i32) -> (i32, i32, i32) {
    %c0_i32 = arith.constant 0 : i32
    %c0_i32_0 = arith.constant 0 : i32
    %c0_i32_1 = arith.constant 0 : i32
    return %arg0, %c0_i32, %c0_i32_0 : i32, i32, i32
  }
  func.func @transform_2(%arg0: i32) -> (i32, i32, i32) {
    %c0_i32 = arith.constant 0 : i32
    %c0_i32_0 = arith.constant 0 : i32
    %c0_i32_1 = arith.constant 0 : i32
    return %arg0, %c0_i32, %c0_i32_0 : i32, i32, i32
  }
  func.func @transform_3(%arg0: i32) -> (i32, i32, i32) {
    %c0_i32 = arith.constant 0 : i32
    %c0_i32_0 = arith.constant 0 : i32
    %c0_i32_1 = arith.constant 0 : i32
    return %arg0, %c0_i32, %c0_i32_0 : i32, i32, i32
  }
  func.func @transform_4(%arg0: i32) -> (i32, i32, i32) {
    %c0_i32 = arith.constant 0 : i32
    %c0_i32_0 = arith.constant 0 : i32
    %c0_i32_1 = arith.constant 0 : i32
    %c0_i32_2 = arith.constant 0 : i32
    return %c0_i32, %c0_i32_0, %c0_i32_1 : i32, i32, i32
  }
  func.func @transform_5(%arg0: i32) -> (i32, i32) {
    %c0_i32 = arith.constant 0 : i32
    %c0_i32_0 = arith.constant 0 : i32
    %c0_i32_1 = arith.constant 0 : i32
    return %c0_i32, %c0_i32_0 : i32, i32
  }
  func.func @transform_6(%arg0: i32) -> (i32, i32) {
    %c0_i32 = arith.constant 0 : i32
    %c0_i32_0 = arith.constant 0 : i32
    %c0_i32_1 = arith.constant 0 : i32
    return %c0_i32, %c0_i32_0 : i32, i32
  }
  func.func @transform_7(%arg0: i32) -> (i32, i32) {
    %c0_i32 = arith.constant 0 : i32
    %c0_i32_0 = arith.constant 0 : i32
    %c0_i32_1 = arith.constant 0 : i32
    return %c0_i32, %c0_i32_0 : i32, i32
  }
  func.func @transform_8(%arg0: i32) -> (i32, i32) {
    %c0_i32 = arith.constant 0 : i32
    %c0_i32_0 = arith.constant 0 : i32
    %c0_i32_1 = arith.constant 0 : i32
    return %c0_i32, %c0_i32_0 : i32, i32
  }
  func.func @transform_9(%arg0: i32) -> (i32, i32) {
    %c0_i32 = arith.constant 0 : i32
    %c0_i32_0 = arith.constant 0 : i32
    %c0_i32_1 = arith.constant 0 : i32
    return %c0_i32, %c0_i32_0 : i32, i32
  }
  func.func @transform_10(%arg0: i32) -> (i32, i32, i32) {
    %c0_i32 = arith.constant 0 : i32
    %c0_i32_0 = arith.constant 0 : i32
    %c0_i32_1 = arith.constant 0 : i32
    return %arg0, %c0_i32, %c0_i32_0 : i32, i32, i32
  }
}

</mosaic_0001>

<bundles_post_ra>
// kernel: tpu_custom_call.1
= control target key start
LH: loop header
LB: loop body
LE: loop exit
PB: predicated region body
PF: predicated region fallthrough
CT: control target
= control target key end

     0   :  { %s2392_s0 = inlined_call_operand.hbm [shape: bf16[2,16,16], index: 0, kind: input, shape index: {}]   ;;  %s2393_s1 = inlined_call_operand.hbm [shape: bf16[2,16,128], index: 1, kind: input, shape index: {}]   ;;  %s2394_s2 = inlined_call_operand.vmem [shape: f32[2,16,16], index: 2, kind: input, shape index: {}]   ;;  %s2395_s3 = inlined_call_operand.vmem [shape: f32[2,16,1], index: 3, kind: input, shape index: {}]   ;;  %s2396_s4 = inlined_call_operand.hbm [shape: bf16[8,16,32], index: 4, kind: input, shape index: {}]   ;;  %s2397_s5 = inlined_call_operand.hbm [shape: bf16[16,32], index: 5, kind: input, shape index: {}]   ;;  %s2398_s6 = inlined_call_operand.vmem [shape: f32[1,32], index: 6, kind: input, shape index: {}]   ;;  %s2399_s7 = inlined_call_operand.vmem [shape: bf16[32,128], index: 7, kind: input, shape index: {}]   ;;  %s2400_s8 = inlined_call_operand.vmem [shape: f32[1,128], index: 8, kind: input, shape index: {}]   ;;  %s2401_s9 = inlined_call_operand.vmem [shape: f32[2,32], index: 9, kind: input, shape index: {}]   ;;  %s2402_s10 = inlined_call_operand.hbm [shape: f32[2,16,32], index: 10, kind: output, shape index: {}]  }
   0x1   :  { %2413 = sst [smem:[#allocation20_spill]] %s2392_s0 }
   0x2   :  { %2414 = sst [smem:[#allocation21_spill]] %s2396_s4 }
   0x3   :  { %2415 = sst [smem:[#allocation22_spill]] %s2397_s5 }
   0x4   :  { %15 = vsyncpa [#allocation3], 0 }
   0x5   :  { %17 = vsyncpa [#allocation3 + $0x1], 0 }
   0x6   :  { %18 = vsyncpa [#allocation6], 0 }
   0x7   :  { %20 = vsyncpa [#allocation6 + $0x1], 0 }
   0x8   :  { %21 = vsyncpa [#allocation9], 0 }
   0x9   :  { %22 = vsyncpa [#allocation4], 0 }
   0xa   :  { %24 = vsyncpa [#allocation4 + $0x1], 0  ;;  %s1993_s13 = smov 0   ;;  %s1995_s14 = smov 0  }
   0xb   :  { %s1997_s15 = smov 0   ;;  %s1999_s16 = smov 0  }
   0xc LB: > { %2416 = sst [smem:[#allocation16_spill]] %s1909_s13  ;;  %s2014_s17 = sadd.s32 4294967295, %s1921_s16   ;;  %s1921_s16 = sphi %s1999_s16, %s2446_s16   ;;  %s1917_s15 = sphi %s1997_s15, %s2443_s15   ;;  %s1913_s14 = sphi %s1995_s14, %s2445_s14   ;;  %s1909_s13 = sphi %s1993_s13, %s2444_s13  }
   0xd   : > { %2417 = sst [smem:[#allocation17_spill]] %s1917_s15  ;;  %s1432_s18 = sadd.s32 4294967294, %s1921_s16  }
   0xe   : > { %p50_p0 = scmp.ne.s32.totalorder %s1913_s14, %s1909_s13  ;;  %p2403_p1 = scmp.eq.s32.totalorder %s2014_s17, 0 }
   0xf   : > { %p284_p3 = scmp.eq.s32.totalorder %s1432_s18, 1  ;;  %p1433_p5 = scmp.ge.s32.totalorder %s1921_s16, 1 }
  0x10   : > { %p2023_p4 = por %p2403_p1, %p50_p0  ;;  %p291_p7 = scmp.lt.s32.totalorder %s1921_s16, 3 }
  0x11   : > { %p2028_p6 = por %p284_p3, %p50_p0  ;;  %s1923_s22 = smov [#allocation7]  }
  0x12   : > { %s2418_s19 = scalar_select %p2023_p4, 1, 0 }
  0x13   : > { %s2419_s20 = scalar_select %p2028_p6, 1, 0 }
  0x14   : > { %p2033_p8 = pnand %p1433_p5, %p291_p7  ;;  %s303_s23 = sshll.u32 %s1923_s22, 4  ;;  %s2037_s23 = int_to_ptr.vmem [resolvable:$true] %s303_s23 }
  0x15   : > { %2420 = sst [smem:[#allocation18_spill]] %s2419_s20  ;;  %s1924_s25 = smov [#allocation8]  }
  0x16   : > { %p1634_p9 = pneg %p2033_p8  ;;  %s316_s26 = sshll.u32 %s1924_s25, 4  ;;  %s2048_s26 = int_to_ptr.vmem [resolvable:$true] %s316_s26 }
  0x17   : > { %s2423_s4 = sld [smem:[#allocation21_spill]] }
  0x18   : > { %p2044_p11 = pnand %p1634_p9, %p2403_p1 }
  0x1a   : > { %p1729_p13 = pneg %p2044_p11 }
  0x1d   : > { %s1727_s29 = scalar_lea.hbm %s2423_s4, 1024 }
  0x1e   : > { %p1728_p12 = scmp.ne.s32.totalorder %s2423_s4, %s1727_s29  ;;  %p1734_p5 = scmp.lt.u32.totalorder %s1727_s29, %s2423_s4 }
  0x20   : > { %p1730_p0 = pnand %p1729_p13, %p1728_p12 }
  0x22   : > { %p1731_p3 = pneg %p1730_p0 }
  0x24   : > { %p1736_p7 = pnand %p1734_p5, %p1731_p3 }
  0x26   : > { %1739 = shalt.err (!%p1736_p7)
}
  0x27   : > { %s1740_s22 = scalar_lea.vmem %s2037_s23, 1024  ;;  %p1748_p2 = scmp.lt.s32.totalorder %s2037_s23, %s2037_s23 }
  0x28   : > { %p1741_p9 = scmp.ne.s32.totalorder %s2037_s23, %s1740_s22  ;;  %p1749_p12 = scmp.lt.s32.totalorder %s1740_s22, %s1740_s22 }
  0x2a   : > { %p1743_p10 = pnand %p1741_p9, %p1729_p13  ;;  %p1750_p0 = por %p1749_p12, %p1748_p2 }
  0x2c   : > { %p1744_p1 = pneg %p1743_p10 }
  0x2e   : > { %p1751_p6 = pnand %p1750_p0, %p1744_p1 }
  0x30   : > { %1754 = shalt.err (!%p1751_p6)
}
  0x31   : > { %s2406_s25 = smov 64   ;;  %s2408_s27 = smov 4  }
  0x32   : > { %1637 = dma.hbm_to_vmem [thread:$0]  (!%p2044_p11), %s2423_s4, 1024, %s2037_s23, [#allocation6], %s2406_s25, %s2406_s25, %s2408_s27  }
  0x33   : > { %s2424_s5 = sld [smem:[#allocation22_spill]] }
  0x39   : > { %s1755_s12 = scalar_lea.hbm %s2424_s5, 128 }
  0x3a   : > { %p1756_p1 = scmp.ne.s32.totalorder %s2424_s5, %s1755_s12  ;;  %p1762_p10 = scmp.lt.u32.totalorder %s1755_s12, %s2424_s5 }
  0x3c   : > { %p1758_p2 = pnand %p1756_p1, %p1729_p13 }
  0x3e   : > { %p1759_p6 = pneg %p1758_p2 }
  0x40   : > { %p1764_p3 = pnand %p1762_p10, %p1759_p6 }
  0x42   : > { %1767 = shalt.err (!%p1764_p3)
}
  0x43   : > { %s1768_s23 = scalar_lea.vmem %s2048_s26, 128  ;;  %p1776_p12 = scmp.lt.s32.totalorder %s2048_s26, %s2048_s26 }
  0x44   : > { %p1769_p5 = scmp.ne.s32.totalorder %s2048_s26, %s1768_s23  ;;  %p1777_p0 = scmp.lt.s32.totalorder %s1768_s23, %s1768_s23 }
  0x46   : > { %p1771_p7 = pnand %p1769_p5, %p1729_p13  ;;  %p1778_p1 = por %p1777_p0, %p1776_p12 }
  0x48   : > { %p1772_p9 = pneg %p1771_p7 }
  0x4a   : > { %p1779_p2 = pnand %p1778_p1, %p1772_p9 }
  0x4c   : > { %1782 = shalt.err (!%p1779_p2)
}
  0x4d   : > { %1640 = dma.hbm_to_vmem [thread:$0]  (!%p2044_p11), %s2424_s5, 128, %s2048_s26, [#allocation9], %s2406_s25, %s2406_s25, %s2408_s27  }
  0x4e   : > { %s2109_s24 = sadd.s32 1, %s1921_s16   ;;  %s37_s28 = sadd.s32 1, %s1917_s15 }
  0x4f   : > { %s34_s29 = ssub.s32 %s1921_s16, %s2109_s24  ;;  %p44_p13 = scmp.ne.s32.totalorder %s1917_s15, %s1913_s14 }
  0x50   : > { %p35_p6 = scmp.eq.s32.totalorder %s34_s29, 0  ;;  %p45_p10 = scmp.eq.s32.totalorder %s1921_s16, 0 }
  0x51   : > { %p2425_p3 = scmp.eq.s32.totalorder %s2014_s17, 1  ;;  %p1654_p7 = scmp.lt.s32.totalorder %s1921_s16, 2 }
  0x52   : > { %s2125_s11 = scalar_select %p35_p6, %s1917_s15, %s37_s28  }
  0x53   : > { %p2119_p5 = por %p2425_p3, %p44_p13  ;;  %p46_p9 = por %p45_p10, %p44_p13 }
  0x54   : > { %2427 = sst [smem:[#allocation19_spill]] %s2125_s11  ;;  %s342_s12 = sand.u32 1, %s1917_s15  }
  0x55   : > { %s2426_s30 = scalar_select %p2119_p5, 1, 0 }
  0x56   : > { %s1437_s18 = sshll.u32 %s342_s12, 3  ;;  %s1487_s26 = sshll.u32 %s1921_s16, 7 }
  0x57   : > { %s2428_s0 = sld [smem:[#allocation20_spill]]  ;;  %s346_s20 = scalar_lea.vmem [#allocation2], %s1437_s18 }
  0x58   : > { %s353_s29 = sshll.u32 %s346_s20, 4  ;;  %p2136_p11 = pnand %p1654_p7, %p46_p9  ;;  %s2134_s29 = int_to_ptr.vmem [resolvable:$true] %s353_s29 }
  0x59   : > { %s2143_s22 = scalar_lea.hbm %s2393_s1, %s1487_s26  ;;  %s367_s23 = scalar_lea.vmem [#allocation5], %s1437_s18 }
  0x5a   : > { %s2145_s4 = sshll.u32 %s367_s23, 4  ;;  %s2147_s5 = scalar_lea.sflag [#allocation3], %s342_s12  ;;  %s2179_s4 = int_to_ptr.vmem [resolvable:$true] %s2145_s4 }
  0x5b   : > { %p1785_p0 = pneg %p2136_p11 }
  0x5d   : > { %s2132_s13 = scalar_lea.hbm %s2428_s0, %s1487_s26  ;;  %s1788_s25 = scalar_lea.hbm %s2428_s0, 256 }
  0x5e   : > { %s1783_s20 = scalar_lea.hbm %s2132_s13, 128  ;;  %p1789_p13 = scmp.lt.u32.totalorder %s2132_s13, %s2428_s0 }
  0x5f   : > { %p1784_p12 = scmp.ne.s32.totalorder %s2132_s13, %s1783_s20  ;;  %p1790_p6 = scmp.lt.u32.totalorder %s1788_s25, %s1783_s20 }
  0x60   : > { %p1792_p3 = scmp.lt.u32.totalorder %s1783_s20, %s2132_s13 }
  0x61   : > { %p1786_p1 = pnand %p1785_p0, %p1784_p12  ;;  %p1791_p10 = por %p1790_p6, %p1789_p13 }
  0x63   : > { %p1787_p2 = pneg %p1786_p1  ;;  %p1793_p7 = por %p1792_p3, %p1791_p10 }
  0x65   : > { %p1794_p9 = pnand %p1793_p7, %p1787_p2 }
  0x67   : > { %1797 = shalt.err (!%p1794_p9)
}
  0x68   : > { %s1798_s12 = scalar_lea.vmem %s2134_s29, 128  ;;  %s1927_s15 = smov [#allocation2]  }
  0x69   : > { %p1799_p12 = scmp.ne.s32.totalorder %s2134_s29, %s1798_s12  ;;  %s1803_s11 = sshll.u32 %s1927_s15, 4  ;;  %s1804_s11 = int_to_ptr.vmem [resolvable:$false] %s1803_s11 }
  0x6a   : > { %s1805_s18 = scalar_lea.vmem %s1804_s11, 256  ;;  %p1806_p4 = scmp.lt.s32.totalorder %s2134_s29, %s1804_s11 }
  0x6b   : > { %p1801_p1 = pnand %p1799_p12, %p1785_p0  ;;  %p1807_p13 = scmp.lt.s32.totalorder %s1805_s18, %s1798_s12 }
  0x6d   : > { %p1802_p5 = pneg %p1801_p1  ;;  %p1808_p6 = por %p1807_p13, %p1806_p4 }
  0x6f   : > { %p1809_p10 = pnand %p1808_p6, %p1802_p5 }
  0x71   : > { %1812 = shalt.err (!%p1809_p10)
}
  0x72   : > { %s2430_s23 = smov 4   ;;  %s2431_s20 = smov 64  }
  0x73   : > { %1644 = dma.hbm_to_vmem [thread:$0]  (!%p2136_p11), %s2132_s13, 128, %s2134_s29, %s2147_s5, %s2431_s20, %s2431_s20, %s2430_s23  }
  0x74   : > { %s363_s25 = sand.u32 1, %s1921_s16   ;;  %s1813_s26 = scalar_lea.hbm %s2143_s22, 128 }
  0x75   : > { %s2182_s27 = scalar_lea.sflag [#allocation6], %s363_s25  ;;  %p1814_p4 = scmp.ne.s32.totalorder %s2143_s22, %s1813_s26 }
  0x76   : > { %s1818_s11 = scalar_lea.hbm %s2393_s1, 256  ;;  %p1819_p3 = scmp.lt.u32.totalorder %s2143_s22, %s2393_s1 }
  0x77   : > { %p1816_p5 = pnand %p1814_p4, %p1785_p0  ;;  %p1820_p7 = scmp.lt.u32.totalorder %s1818_s11, %s1813_s26 }
  0x78   : > { %p1822_p12 = scmp.lt.u32.totalorder %s1813_s26, %s2143_s22 }
  0x79   : > { %p1817_p2 = pneg %p1816_p5  ;;  %p1821_p9 = por %p1820_p7, %p1819_p3 }
  0x7b   : > { %p1823_p1 = por %p1822_p12, %p1821_p9 }
  0x7d   : > { %p1824_p13 = pnand %p1823_p1, %p1817_p2 }
  0x7f   : > { %1827 = shalt.err (!%p1824_p13)
}
  0x80   : > { %s1828_s5 = scalar_lea.vmem %s2179_s4, 128  ;;  %s1928_s13 = smov [#allocation5]  }
  0x81   : > { %p1829_p6 = scmp.ne.s32.totalorder %s2179_s4, %s1828_s5  ;;  %s1833_s29 = sshll.u32 %s1928_s13, 4  ;;  %s1834_s29 = int_to_ptr.vmem [resolvable:$false] %s1833_s29 }
  0x82   : > { %s1835_s0 = scalar_lea.vmem %s1834_s29, 256  ;;  %p1836_p5 = scmp.lt.s32.totalorder %s2179_s4, %s1834_s29 }
  0x83   : > { %p1831_p10 = pnand %p1829_p6, %p1785_p0  ;;  %p1837_p3 = scmp.lt.s32.totalorder %s1835_s0, %s1828_s5 }
  0x85   : > { %p1832_p4 = pneg %p1831_p10  ;;  %p1838_p7 = por %p1837_p3, %p1836_p5 }
  0x87   : > { %p1839_p9 = pnand %p1838_p7, %p1832_p4 }
  0x89   : > { %1842 = shalt.err (!%p1839_p9)
}
  0x8a   : > { %1647 = dma.hbm_to_vmem [thread:$0]  (!%p2136_p11), %s2143_s22, 128, %s2179_s4, %s2182_s27, %s2431_s20, %s2431_s20, %s2430_s23  }
  0x8b   : > { %402 = sbr.rel (%p2033_p8) target bundleno = 1784 (0x6f8), region = 60  ;;  %s2214_s25 = sand.u32 (!%p2033_p8), 1, %s1913_s14  }
  0x8c   : > { %s1444_s26 = sshll.u32 (!%p2033_p8), %s2214_s25, 3  ;;  %s405_s12 = scalar_lea.sflag (!%p2033_p8), [#allocation3], %s2214_s25 }
  0x8d   : > { %s408_s15 = scalar_lea.vmem (!%p2033_p8), [#allocation2], %s1444_s26  ;;  %p2432_p0 = scmp.ne.s32.totalorder (!%p2033_p8), %s2418_s19, 0 }
  0x92   : > { %1888 = dma.done.wait (%p2432_p0), %s405_s12, 128  }
  0x93   : > { %1890 = vsyncadd (%p2432_p0), %s405_s12, 4294967168  ;;  %s413_s4 = sand.u32 1, %s2014_s17   ;;  %s2223_s21 = scalar_lea.vmem [#allocation5], %s1444_s26 }
  0x94   : > { %s414_s28 = scalar_lea.sflag [#allocation6], %s413_s4 }
  0x95   : > { %1892 = dma.done.wait (%p2432_p0), %s414_s28, 128  }
  0x96   : > { %1894 = vsyncadd (%p2432_p0), %s414_s28, 4294967168  ;;  %p2433_p8 = scmp.eq.s32.totalorder %s2014_s17, 0 }
  0x98   : > { %1896 = dma.done.wait (%p2433_p8), [#allocation6], 1024   ;;  %p2434_p11 = pmov %p2433_p8 }
  0x99   : > { %p2435_p2 = pmov %p2433_p8 }
  0x9a   : > { %1898 = vsyncadd (%p2434_p11), [#allocation6], 4294966272 }
  0x9b   : > { %1900 = dma.done.wait (%p2435_p2), [#allocation9], 128   ;;  %p2436_p12 = pmov %p2435_p2 }
  0x9c   : > { %v1929_v0 = vmov 0.0   ;;  %vm1930_vm0 = vmmov 0   ;;  %v1704_v1 = vld [vmem:[#allocation7] sm:$0xff]   ;;  %v1705_v2 = vld [vmem:[#allocation7 + $0x8] sm:$0xff]   ;;  %vm517_vm1 = vcmask 130048   ;;  %v1707_v4 = vld [vmem:[#allocation7 + $0x10] sm:$0xff]  }
  0x9d   : > { %1902 = vsyncadd (%p2436_p12), [#allocation9], 4294967168  ;;  %1526 = vmatprep.subr.bf16.mxu0 %v1929_v0  ;;  %1532 = vmatprep.subr.bf16.mxu1 %v1929_v0  ;;  %v1706_v3 = vld [vmem:[%s408_s15] sm:$0xff]   ;;  %v1708_v5 = vld [vmem:[#allocation7 + $0x18] sm:$0xff]   ;;  %vm1030_vm2 = vcmask 261120   ;;  %s1931_s13 = smov 96  }
  0x9e   : > { %1528 = vmatprep.mubr.msk.bf16.mxu0 %vm1930_vm0, %v1929_v0  ;;  %1534 = vmatprep.mubr.msk.bf16.mxu1 %vm1930_vm0, %v1929_v0  ;;  %v1709_v6 = vld [vmem:[#allocation7 + $0x20] sm:$0xff]   ;;  %v1710_v7 = vld [vmem:[#allocation7 + $0x28] sm:$0xff]   ;;  %v1711_v8 = vld [vmem:[#allocation7 + $0x30] sm:$0xff]   ;;  %p477_p1 = scmp.lt.s32.totalorder %s2014_s17, 1  ;;  %s1932_s4 = smov 32  }
  0x9f   : > { %1527 = vmatpush3.bf16.msra.mxu0 %v1704_v1  ;;  %1533 = vmatpush3.bf16.msra.mxu1 %v1705_v2  ;;  %v1712_v9 = vld [vmem:[#allocation7 + $0x38] sm:$0xff]   ;;  %v1713_v10 = vld [vmem:[#allocation8] sm:$0xff]   ;;  %v1716_v57 = vld [vmem:[%s2399_s7 + $0x8] sm:$0xff]   ;;  %s1934_s22 = smov 64   ;;  %s1448_s23 = sshll.u32 %s2214_s25, 4 }
  0xa0   : > { %1538 = vmatprep.subr.bf16.mxu0 %v1929_v0  ;;  %1544 = vmatprep.subr.bf16.mxu1 %v1929_v0  ;;  %v1714_v51 = vld [vmem:[%s2223_s21] sm:$0xff]   ;;  %v1715_v56 = vld [vmem:[%s2399_s7] sm:$0xff]   ;;  %s2311_s29 = scalar_select %p477_p1, %s2014_s17, 1 }
  0xa1   : > { %v1473_v61 = vld [vmem:[%s2398_s6] ss:$0 sm:$0xff]  ;;  %s1491_s5 = sshll.u32 %s2014_s17, 8  ;;  %s1280_s17 = scalar_lea.sflag [#allocation4], %s2214_s25 }
  0xa2   : > { %1529 = vmatmul.mubr.msk.bf16.vlgmr.msra.gmra.mrb[0].mxu0 %vm517_vm1, %v1706_v3  ;;  %1535 = vmatmul.mubr.msk.bf16.vlgmr.msra.gmra.mrb[0].mxu1 %vm517_vm1, %v1706_v3  ;;  %s1489_s0 = sshll.u32 %s2311_s29, 4  ;;  %s2344_s12 = scalar_lea.hbm %s2402_s10, %s1491_s5 }
  0xa3   : > { %1539 = vmatpush3.bf16.msra.mxu0 %v1707_v4  ;;  %1545 = vmatpush3.bf16.msra.mxu1 %v1708_v5  ;;  %v1474_v5 = vld [vmem:[%s2400_s8] ss:$0 sm:$0xff]  ;;  %s481_s15 = scalar_lea.vmem %s2394_s2, %s1489_s0  ;;  %s486_s19 = scalar_lea.vmem %s2395_s3, %s1489_s0 }
  0xa4   : > { %1540 = vmatprep.mubr.msk.bf16.mxu0 %vm1930_vm0, %v1929_v0  ;;  %1546 = vmatprep.mubr.msk.bf16.mxu1 %vm1930_vm0, %v1929_v0  ;;  %p2437_p6 = scmp.ne.s32.totalorder %s2426_s30, 0 }
  0xa5   : > { %1550 = vmatprep.subr.bf16.mxu0 %v1929_v0  ;;  %1556 = vmatprep.subr.bf16.mxu1 %v1929_v0 }
  0xaa   : > { %1541 = vmatmul.mubr.msk.bf16.vlgmr.msra.gmra.mrb[4].mxu0 %vm517_vm1, %v1706_v3  ;;  %1547 = vmatmul.mubr.msk.bf16.vlgmr.msra.gmra.mrb[4].mxu1 %vm517_vm1, %v1706_v3 }
  0xab   : > { %1551 = vmatpush3.bf16.msra.mxu0 %v1709_v6  ;;  %1557 = vmatpush3.bf16.msra.mxu1 %v1710_v7 }
  0xac   : > { %1552 = vmatprep.mubr.msk.bf16.mxu0 %vm1930_vm0, %v1929_v0  ;;  %1558 = vmatprep.mubr.msk.bf16.mxu1 %vm1930_vm0, %v1929_v0 }
  0xad   : > { %1562 = vmatprep.subr.bf16.mxu0 %v1929_v0  ;;  %1568 = vmatprep.subr.bf16.mxu1 %v1929_v0 }
  0xb2   : > { %1553 = vmatmul.mubr.msk.bf16.vlgmr.msra.gmra.mrb[8].mxu0 %vm517_vm1, %v1706_v3  ;;  %1559 = vmatmul.mubr.msk.bf16.vlgmr.msra.gmra.mrb[8].mxu1 %vm517_vm1, %v1706_v3 }
  0xb3   : > { %1563 = vmatpush3.bf16.msra.mxu0 %v1711_v8  ;;  %1569 = vmatpush3.bf16.msra.mxu1 %v1712_v9 }
  0xb4   : > { %1564 = vmatprep.mubr.msk.bf16.mxu0 %vm1930_vm0, %v1929_v0  ;;  %1570 = vmatprep.mubr.msk.bf16.mxu1 %vm1930_vm0, %v1929_v0 }
  0xb5   : > { %1580 = vmatprep.subr.bf16.mxu1 %v1929_v0  ;;  %1574 = vmatprep.subr.bf16.mxu0 %v1929_v0 }
  0xba   : > { %1565 = vmatmul.mubr.msk.bf16.vlgmr.msra.gmra.mrb[12].mxu0 %vm517_vm1, %v1706_v3  ;;  %1571 = vmatmul.mubr.msk.bf16.vlgmr.msra.gmra.mrb[12].mxu1 %vm517_vm1, %v1706_v3 }
  0xbb   : > { %1576 = vmatprep.mubr.msk.bf16.mxu0 %vm1930_vm0, %v1929_v0  ;;  %1596 = vmatprep.mubr.msk.bf16.mxu1 %vm1930_vm0, %v1929_v0 }
  0xbc   : > { %1575 = vmatpush3.bf16.msra.mxu0 %v1713_v10 }
  0xbd   : > { %1600 = vmatprep.subr.bf16.mxu0 %v1929_v0 }
  0xc2   : > { %1577 = vmatmul.mubr.msk.bf16.vlgmr.msra.gmra.mrb[16].mxu0 %vm517_vm1, %v1706_v3 }
  0xc3   : > { %1604 = vmatprep.mubr.msk.bf16.mxu0 %vm1930_vm0, %v1929_v0  ;;  %1601 = vmatpush3.bf16.msra.mxu0 %v1715_v56 }
  0xc4   : > { %1602 = vmatprep.subr.bf16.mxu0 %v1929_v0 }
  0xc7   : > { %1603 = vmatpush3.bf16.msra.mxu0 %v1716_v57 }
  0xc8   : > { %1608 = vmatprep.subr.bf16.mxu0 %v1929_v0 }
 0x175   : > { %v555_v11 = vpop.f32.mrb[0].mxu0  ;;  %v602_v13 = vpop.f32.mrb[0].mxu1 }
 0x176   : > { %v1530_v12 = vpop.f32.mrb[1].mxu0  ;;  %v1536_v15 = vpop.f32.mrb[1].mxu1 }
 0x177   : > { %v558_v14 = vpop.f32.mrb[2].mxu0  ;;  %v605_v18 = vpop.f32.mrb[2].mxu1 }
 0x178   : > { %v891_v16 = vpack.c.bf16 %v558_v14, %v555_v11  ;;  %v1531_v17 = vpop.f32.mrb[3].mxu0  ;;  %v892_v19 = vpack.c.bf16 %v605_v18, %v602_v13  ;;  %v1537_v20 = vpop.f32.mrb[3].mxu1 }
 0x179   : > { %v1129_v20 = vld [vmem:[%s481_s15 + $0x8] sm:$0xff] }
 0x17a   : > { %1581 = vmatpush3.bf16.msra.mxu1 %v891_v16  ;;  %v1128_v16 = vld [vmem:[%s481_s15] sm:$0xff] }
 0x17b   : > { %1582 = vmatprep.subr.bf16.mxu1 %v1929_v0 }
 0x17d   : > { %v649_v21 = vpop.f32.mrb[4].mxu0  ;;  %v696_v23 = vpop.f32.mrb[4].mxu1 }
 0x17e   : > { %v1542_v22 = vpop.f32.mrb[5].mxu0  ;;  %1583 = vmatpush3.bf16.msra.mxu1 %v892_v19  ;;  %v1548_v25 = vpop.f32.mrb[5].mxu1 }
 0x17f   : > { %v652_v24 = vpop.f32.mrb[6].mxu0  ;;  %1584 = vmatprep.subr.bf16.mxu1 %v1929_v0  ;;  %v699_v28 = vpop.f32.mrb[6].mxu1 }
 0x180   : > { %v893_v26 = vpack.c.bf16 %v652_v24, %v649_v21  ;;  %v1543_v27 = vpop.f32.mrb[7].mxu0  ;;  %v894_v29 = vpack.c.bf16 %v699_v28, %v696_v23  ;;  %v1549_v30 = vpop.f32.mrb[7].mxu1 }
 0x182   : > { %1585 = vmatpush3.bf16.msra.mxu1 %v893_v26  ;;  %v1933_v26 = vmov 0  }
 0x183   : > { %1586 = vmatprep.subr.bf16.mxu1 %v1929_v0  ;;  %1702 = vset.pattern.permute.xlu1 %v1933_v26 }
 0x184   : > { %1703 = vset.pattern.permute.xlu0 %v1933_v26 }
 0x185   : > { %v743_v31 = vpop.f32.mrb[8].mxu0  ;;  %v790_v33 = vpop.f32.mrb[8].mxu1 }
 0x186   : > { %v1554_v32 = vpop.f32.mrb[9].mxu0  ;;  %1587 = vmatpush3.bf16.msra.mxu1 %v894_v29  ;;  %v1560_v35 = vpop.f32.mrb[9].mxu1 }
 0x187   : > { %v746_v34 = vpop.f32.mrb[10].mxu0  ;;  %1588 = vmatprep.subr.bf16.mxu1 %v1929_v0  ;;  %v793_v38 = vpop.f32.mrb[10].mxu1 }
 0x188   : > { %v895_v36 = vpack.c.bf16 %v746_v34, %v743_v31  ;;  %v1555_v37 = vpop.f32.mrb[11].mxu0  ;;  %v896_v39 = vpack.c.bf16 %v793_v38, %v790_v33  ;;  %v1561_v40 = vpop.f32.mrb[11].mxu1  ;;  %v1203_v38 = vld [vmem:[%s486_s19 + $0x8] sm:$0xff] }
 0x189   : > { %v1202_v37 = vld [vmem:[%s486_s19] sm:$0xff] }
 0x18a   : > { %1589 = vmatpush3.bf16.msra.mxu1 %v895_v36 }
 0x18b   : > { %1590 = vmatprep.subr.bf16.mxu1 %v1929_v0 }
 0x18d   : > { %v837_v41 = vpop.f32.mrb[12].mxu0  ;;  %v884_v43 = vpop.f32.mrb[12].mxu1 }
 0x18e   : > { %v1566_v42 = vpop.f32.mrb[13].mxu0  ;;  %1591 = vmatpush3.bf16.msra.mxu1 %v896_v39  ;;  %v1572_v45 = vpop.f32.mrb[13].mxu1 }
 0x18f   : > { %v840_v44 = vpop.f32.mrb[14].mxu0  ;;  %1592 = vmatprep.subr.bf16.mxu1 %v1929_v0  ;;  %v887_v48 = vpop.f32.mrb[14].mxu1 }
 0x190   : > { %v897_v46 = vpack.c.bf16 %v840_v44, %v837_v41  ;;  %v1567_v47 = vpop.f32.mrb[15].mxu0  ;;  %v898_v49 = vpack.c.bf16 %v887_v48, %v884_v43  ;;  %v1573_v50 = vpop.f32.mrb[15].mxu1 }
 0x192   : > { %1593 = vmatpush3.bf16.msra.mxu1 %v897_v46 }
 0x193   : > { %1594 = vmatprep.subr.bf16.mxu1 %v1929_v0 }
 0x195   : > { %v943_v52 = vpop.f32.mrb[16].mxu0 }
 0x196   : > { %1595 = vmatpush3.bf16.msra.mxu1 %v898_v49  ;;  %v1578_v53 = vpop.f32.mrb[17].mxu0 }
 0x197   : > { %v946_v54 = vpop.f32.mrb[18].mxu0 }
 0x198   : > { %v1579_v55 = vpop.f32.mrb[19].mxu0 }
 0x199   : > { %1597 = vmatmul.mubr.bf16.vlgmr.msra.gmra.mrb[16].mxu1 %v1714_v51 }
 0x26c   : > { %v990_v58 = vpop.f32.mrb[16].mxu1 }
 0x26d   : > { %v991_v59 = vadd.f32 %v990_v58, %v943_v52  ;;  %v1598_v60 = vpop.f32.mrb[17].mxu1 }
 0x26e   : > { %v993_v62 = vpop.f32.mrb[18].mxu1 }
 0x26f   : > { %v994_v63 = vadd.f32 %v993_v62, %v946_v54  ;;  %v1599_v1 = vpop.f32.mrb[19].mxu1  ;;  %v1004_v2 = vadd.f32 %v1473_v61, %v991_v59 }
 0x271   : > { %v1005_v3 = vadd.f32 %v1473_v61, %v994_v63 }
 0x273   : > { %v1006_v4 = vpack.c.bf16 %v1005_v3, %v1004_v2 }
 0x275   : > { %1605 = vmatmul.mubr.msk.bf16.vlgmr.msra.gmra.mrb[20].mxu0 %vm1030_vm2, %v1006_v4 }
 0x276   : > { %1610 = vmatprep.mubr.msk.bf16.mxu0 %vm1930_vm0, %v1929_v0 }
 0x348   : > { %v1068_v6 = vpop.f32.mrb[20].mxu0 }
 0x349   : > { %v1606_v7 = vpop.f32.mrb[21].mxu0  ;;  %v1069_v9 = vadd.f32 %v1474_v5, %v1068_v6 }
 0x34a   : > { %v1071_v8 = vpop.f32.mrb[22].mxu0 }
 0x34b   : > { %v1072_v10 = vadd.f32 %v1474_v5, %v1071_v8  ;;  %v1607_v11 = vpop.f32.mrb[23].mxu0 }
 0x34d   : > { %v1075_v12 = vpack.c.bf16 %v1072_v10, %v1069_v9 }
 0x34f   : > { %1077 = vrot.lane.b32.xlu0 %v1075_v12, %s1931_s13  ;;  %s476_s13 = scalar_lea.vmem [#allocation10], %s1448_s23 }
 0x350   : > { %s1293_s29 = sshll.u32 %s476_s13, 4  ;;  %s2346_s29 = int_to_ptr.vmem [resolvable:$true] %s1293_s29 }
 0x351   : > { %s1843_s15 = scalar_lea.vmem %s2346_s29, 256 }
 0x352   : > { %p1844_p13 = scmp.ne.s32.totalorder %s2346_s29, %s1843_s15 }
 0x354   : > { %p1845_p10 = pnand %p1844_p13, %p2437_p6 }
 0x356   : > { %p1846_p4 = pneg %p1845_p10 }
 0x3c1   : > { %v1078_v13 = vpop.permute.xlu0 %1077 }
 0x3c2   : > { %v1083_v14 = vsel %vm1030_vm2, %v1078_v13, 0 }
 0x3c3   : > { %1609 = vmatpush3.bf16.xpose.msra.mxu0 %v1083_v14 }
 0x3c4   : > { %1614 = vmatprep.subr.bf16.mxu0 %v1929_v0 }
 0x3ca   : > { %1611 = vmatmul.mubr.msk.bf16.vlgmr.msra.gmra.mrb[24].mxu0 %vm1030_vm2, %v1075_v12 }
 0x3cb   : > { %1616 = vmatprep.mubr.msk.bf16.mxu0 %vm1930_vm0, %v1929_v0 }
 0x49d   : > { %v1119_v15 = vpop.f32.mrb[24].mxu0 }
 0x49e   : > { %v1126_v17 = vmul.f32 0.17677669, %v1119_v15  ;;  %v1612_v18 = vpop.f32.mrb[25].mxu0 }
 0x49f   : > { %v1122_v19 = vpop.f32.mrb[26].mxu0 }
 0x4a0   : > { %v1127_v21 = vmul.f32 0.17677669, %v1122_v19  ;;  %v1613_v22 = vpop.f32.mrb[27].mxu0  ;;  %v1130_v0 = vadd.f32 %v1128_v16, %v1126_v17 }
 0x4a2   : > { %v1132_v23 = vsel %vm517_vm1, %v1130_v0, -inf  ;;  %v1131_v24 = vadd.f32 %v1129_v20, %v1127_v21 }
 0x4a3   : > { %1133 = vmax.xlane.f32.xlu0 %v1132_v23 }
 0x4a4   : > { %v1135_v25 = vsel %vm517_vm1, %v1131_v24, -inf }
 0x4a5   : > { %1136 = vmax.xlane.f32.xlu1 %v1135_v25 }
 0x4b9   : > { %1218 = vrot.lane.b32.xlu0 %v1069_v9, %s1932_s4 }
 0x530   : > { %v1134_v27 = vpop.xlane.xlu0 %1133 }
 0x531   : > { %v1138_v28 = vsub.f32 %v1130_v0, %v1134_v27  ;;  %v1481_v27 = vld [vmem:[%s2401_s9 + $0x1] ss:$0 sm:$0xff] }
 0x532   : > { %v1137_v29 = vpop.xlane.xlu1 %1136 }
 0x533   : > { %v1140_v30 = vmul.f32 1.442695, %v1138_v28  ;;  %v1139_v31 = vsub.f32 %v1131_v24, %v1137_v29  ;;  %v1480_v24 = vld [vmem:[%s2401_s9] ss:$0 sm:$0xff] }
 0x534   : > { %v1219_v52 = vpop.permute.xlu0 %1218 }
 0x535   : > { %1717 = vpow2.f32 %v1140_v30  ;;  %v1142_v32 = vmul.f32 1.442695, %v1139_v31 }
 0x537   : > { %1719 = vpow2.f32 %v1142_v32 }
 0x53f   : > { %v1718_v33 = vpop.eup %1717 }
 0x540   : > { %v1144_v34 = vsel %vm517_vm1, %v1718_v33, 0.0 }
 0x541   : > { %v1720_v35 = vpop.eup %1719  ;;  %1145 = vadd.xlane.f32.xlu1 %v1144_v34 }
 0x542   : > { %v1147_v36 = vsel %vm517_vm1, %v1720_v35, 0.0 }
 0x545   : > { %1148 = vadd.xlane.f32.xlu1 %v1147_v36 }
 0x556   : > { %1155 = vrot.lane.b32.xlu1 %v1075_v12, %s1934_s22 }
 0x55a   : > { %1206 = vperm.xlu1 %1702, %v1202_v37  }
 0x55e   : > { %1211 = vperm.xlu1 %1702, %v1203_v38  }
 0x562   : > { %1220 = vrot.lane.b32.xlu1 %v1072_v10, %s1932_s4  ;;  %s1935_s4 = smov [#allocation10]  }
 0x563   : > { %s1847_s28 = sshll.u32 %s1935_s4, 4  ;;  %s1848_s28 = int_to_ptr.vmem [resolvable:$false] %s1847_s28 }
 0x564   : > { %s1849_s21 = scalar_lea.vmem %s1848_s28, 512  ;;  %p1850_p5 = scmp.lt.s32.totalorder %s2346_s29, %s1848_s28 }
 0x565   : > { %p1851_p3 = scmp.lt.s32.totalorder %s1849_s21, %s1843_s15 }
 0x567   : > { %p1852_p7 = por %p1851_p3, %p1850_p5 }
 0x569   : > { %p1853_p9 = pnand %p1852_p7, %p1846_p4 }
 0x5ce   : > { %v1146_v39 = vpop.xlane.xlu1 %1145 }
 0x5cf   : > { %1721 = vrcp.f32 %v1146_v39 }
 0x5d2   : > { %v1149_v40 = vpop.xlane.xlu1 %1148 }
 0x5d3   : > { %1723 = vrcp.f32 %v1149_v40 }
 0x5d6   : > { %v1156_v41 = vpop.permute.xlu1 %1155 }
 0x5d7   : > { %1615 = vmatpush3.bf16.msra.mxu0 %v1156_v41 }
 0x5d9   : > { %v1722_v42 = vpop.eup %1721 }
 0x5da   : > { %v1152_v44 = vmul.f32 %v1722_v42, %v1718_v33  ;;  %v1207_v47 = vpop.permute.xlu1 %1206 }
 0x5dd   : > { %v1724_v43 = vpop.eup %1723 }
 0x5de   : > { %v1153_v45 = vmul.f32 %v1724_v43, %v1720_v35  ;;  %v1212_v48 = vpop.permute.xlu1 %1211 }
 0x5e0   : > { %v1154_v46 = vpack.c.bf16 %v1153_v45, %v1152_v44 }
 0x5e2   : > { %1617 = vmatmul.mubr.msk.bf16.vlgmr.msra.gmra.mrb[28].mxu0 %vm517_vm1, %v1154_v46  ;;  %v1221_v57 = vpop.permute.xlu1 %1220 }
 0x6b5   : > { %v1195_v49 = vpop.f32.mrb[28].mxu0 }
 0x6b6   : > { %v1214_v50 = vmul.f32 %v1207_v47, %v1195_v49  ;;  %v1618_v51 = vpop.f32.mrb[29].mxu0 }
 0x6b7   : > { %v1198_v53 = vpop.f32.mrb[30].mxu0 }
 0x6b8   : > { %v1224_v54 = vadd.f32 %v1219_v52, %v1214_v50  ;;  %v1215_v55 = vmul.f32 %v1212_v48, %v1198_v53  ;;  %v1619_v56 = vpop.f32.mrb[31].mxu0 }
 0x6ba   : > { %v1235_v58 = vmul.f32 %v1224_v54, %v1224_v54  ;;  %v1225_v59 = vadd.f32 %v1221_v57, %v1215_v55  ;;  %v1226_v60 = vsel %vm1030_vm2, %v1224_v54, 0.0 }
 0x6bc   : > { %v1227_v61 = vsel %vm1030_vm2, %v1225_v59, 0.0  ;;  %v1236_v62 = vmul.f32 %v1225_v59, %v1225_v59  ;;  %v1237_v1 = vsel %vm1030_vm2, %v1235_v58, 0.0 }
 0x6bd   : > { %v1228_v63 = vadd.f32 %v1227_v61, %v1226_v60 }
 0x6be   : > { %v1238_v2 = vsel %vm1030_vm2, %v1236_v62, 0.0 }
 0x6bf   : > { %v1229_v3 = vrot.slane %v1228_v63, 4  ;;  %v1239_v4 = vadd.f32 %v1238_v2, %v1237_v1 }
 0x6c1   : > { %v1230_v5 = vadd.f32 %v1229_v3, %v1228_v63  ;;  %v1240_v6 = vrot.slane %v1239_v4, 4 }
 0x6c3   : > { %v1231_v7 = vrot.slane %v1230_v5, 2  ;;  %v1241_v8 = vadd.f32 %v1240_v6, %v1239_v4 }
 0x6c5   : > { %v1232_v9 = vadd.f32 %v1231_v7, %v1230_v5  ;;  %v1242_v10 = vrot.slane %v1241_v8, 2 }
 0x6c7   : > { %v1233_v11 = vrot.slane %v1232_v9, 1  ;;  %v1243_v12 = vadd.f32 %v1242_v10, %v1241_v8 }
 0x6c9   : > { %v1234_v13 = vadd.f32 %v1233_v11, %v1232_v9  ;;  %v1244_v14 = vrot.slane %v1243_v12, 1 }
 0x6cb   : > { %v1245_v15 = vadd.f32 %v1244_v14, %v1243_v12  ;;  %v1246_v16 = vmul.f32 0.0625, %v1234_v13 }
 0x6cd   : > { %v1247_v17 = vmul.f32 0.0625, %v1245_v15  ;;  %v1248_v18 = vmul.f32 %v1246_v16, %v1246_v16  ;;  %v1253_v19 = vsub.f32 %v1224_v54, %v1246_v16  ;;  %v1254_v20 = vsub.f32 %v1225_v59, %v1246_v16 }
 0x6cf   : > { %v1249_v21 = vsub.f32 %v1247_v17, %v1248_v18 }
 0x6d1   : > { %v1250_v22 = vmax.f32 %v1249_v21, 0.0 }
 0x6d3   : > { %v1255_v0 = vadd.f32 1e-05, %v1250_v22 }
 0x6d5   : > { %1725 = vrsqrt.f32 %v1255_v0 }
 0x6df   : > { %v1726_v23 = vpop.eup %1725 }
 0x6e0   : > { %v1257_v25 = vmul.f32 %v1726_v23, %v1253_v19  ;;  %v1258_v26 = vmul.f32 %v1726_v23, %v1254_v20 }
 0x6e2   : > { %v1263_v28 = vmul.f32 %v1480_v24, %v1257_v25  ;;  %v1264_v29 = vmul.f32 %v1480_v24, %v1258_v26 }
 0x6e4   : > { %v1269_v30 = vadd.f32 %v1481_v27, %v1263_v28  ;;  %v1270_v31 = vadd.f32 %v1481_v27, %v1264_v29 }
 0x6e6   : > { %vm1271_vm3 = vcmp.gt.f32.partialorder %v1269_v30, 0.0  ;;  %vm1272_vm4 = vcmp.gt.f32.partialorder %v1270_v31, 0.0  ;;  %v1273_v32 = vmul.f32 0.01, %v1269_v30  ;;  %v1274_v33 = vmul.f32 0.01, %v1270_v31 }
 0x6e8   : > { %v1276_v34 = vsel %vm1272_vm4, %v1270_v31, %v1274_v33  ;;  %v1275_v35 = vsel %vm1271_vm3, %v1269_v30, %v1273_v32 }
 0x6e9   : > { %1277 = vst.msk [vmem:[%s476_s13] sm:$0xff] %vm1030_vm2, %v1275_v35  ;;  %1278 = vst.msk [vmem:[%s476_s13 + $0x8] sm:$0xff] %vm1030_vm2, %v1276_v34 }
 0x6ea   : > { %1856 = shalt.err (!%p1853_p9)
}
 0x6eb   : > { %s1857_s19 = scalar_lea.hbm %s2344_s12, 256  ;;  %s1861_s20 = scalar_lea.hbm %s2402_s10, 512 }
 0x6ec   : > { %p1858_p0 = scmp.ne.s32.totalorder %s2344_s12, %s1857_s19  ;;  %p1862_p2 = scmp.lt.u32.totalorder %s2344_s12, %s2402_s10 }
 0x6ed   : > { %p1863_p12 = scmp.lt.u32.totalorder %s1861_s20, %s1857_s19  ;;  %p1865_p13 = scmp.lt.u32.totalorder %s1857_s19, %s2344_s12 }
 0x6ee   : > { %p1859_p8 = pnand %p1858_p0, %p2437_p6 }
 0x6ef   : > { %p1864_p1 = por %p1863_p12, %p1862_p2 }
 0x6f0   : > { %p1860_p11 = pneg %p1859_p8 }
 0x6f1   : > { %p1866_p10 = por %p1865_p13, %p1864_p1 }
 0x6f3   : > { %p1867_p4 = pnand %p1866_p10, %p1860_p11 }
 0x6f5   : > { %1870 = shalt.err (!%p1867_p4)
}
 0x6f6   : > { %s1936_s18 = smov 128   ;;  %s1937_s5 = smov 8  }
 0x6f7   : > { %1632 = dma.vmem_to_hbm [thread:$0]  (%p2437_p6), %s2346_s29, 256, %s2344_s12, %s1280_s17, %s1936_s18, %s1936_s18, %s1937_s5  }
 0x6f8 PF: > { %s2438_s13 = sld [smem:[#allocation16_spill]]  ;;  %s2439_s0 = sld [smem:[#allocation18_spill]] }
 0x6f9   : > { %p2441_p3 = scmp.ge.s32.totalorder %s1921_s16, 2 }
 0x6fe   : > { %s1308_s26 = sand.u32 1, %s2438_s13   ;;  %p2440_p5 = scmp.ne.s32.totalorder %s2439_s0, 0 }
 0x6ff   : > { %s1309_s15 = scalar_lea.sflag [#allocation4], %s1308_s26 }
 0x700   : > { %p1649_p7 = pnand %p2441_p3, %p2440_p5 }
 0x702   : > { %1904 = dma.done.wait (!%p1649_p7), %s1309_s15, 256  }
 0x703   : > { %1906 = vsyncadd (!%p1649_p7), %s1309_s15, 4294967040  ;;  %s2442_s4 = sld [smem:[#allocation17_spill]]  ;;  %s2443_s15 = sld [smem:[#allocation19_spill]] }
 0x704   : > { %p27_p9 = scmp.ge.s32.totalorder %s2109_s24, 4   ;;  %s2444_s13 = smov %s1913_s14 }
 0x705   : > { %s2446_s16 = smov %s2109_s24 }
 0x706   :  { %29 = sbr.rel (!%p27_p9) target bundleno = 12 (0xc), region = 132 }
 0x709   : > { %s2445_s14 = smov %s2442_s4 }
 0x70d   :  { %1314 = vsyncpa [#allocation3], 1 }
 0x70e   :  { %1316 = vsyncpa [#allocation3 + $0x1], 1 }
 0x70f   :  { %1317 = vsyncpa [#allocation6], 1 }
 0x710   :  { %1319 = vsyncpa [#allocation6 + $0x1], 1 }
 0x711   :  { %1320 = vsyncpa [#allocation9], 1 }
 0x712   :  { %1321 = vsyncpa [#allocation4], 1 }
 0x713   :  { %1323 = vsyncpa [#allocation4 + $0x1], 1 }

</bundles_post_ra>
